<compile_context>
chip_gen: v7x
topology: tpu7x:2x2x1
jax: 0.10.0
libtpu: 0.0.40
codegen_flags: <defaults>
</compile_context>

<pallas_src>
import functools

import jax
import jax.numpy as jnp
from jax.experimental import pallas as pl
from jax.experimental.pallas import tpu as pltpu


def _round_up(x, m):
    return (x + m - 1) // m * m


def _pad_to(a, shape):
    pads = [(0, s - d) for d, s in zip(a.shape, shape)]
    return jnp.pad(a, pads)


def _head_kernel(x_ref, w1_ref, b1_ref, w2_ref, b2_ref, out_ref, *, inv_hw):
    # x_ref: (TB, HW, C) feature tile, channels on lanes.
    x = x_ref[...]

    # Global average pool over spatial positions (sublane reduction), f32 acc.
    pooled = jnp.sum(x.astype(jnp.float32), axis=1) * jnp.float32(inv_hw)  # (TB, C)

    # _dropout = nn.Dropout(0.0): identity.

    # Linear(C -> 1024-padded): pooled @ W1 + b1.
    h = jnp.dot(pooled, w1_ref[...], preferred_element_type=jnp.float32)
    h = h + b1_ref[...]

    # LeakyReLU, PyTorch default negative_slope = 0.01.
    h = jnp.where(h > 0, h, jnp.float32(0.01) * h)

    # Dropout(0.13) at inference: identity.

    # Linear(1024-padded -> 128-padded); padding is zero so result is exact.
    out = jnp.dot(h, w2_ref[...], preferred_element_type=jnp.float32)
    out = out + b2_ref[...]

    out_ref[...] = out.astype(out_ref.dtype)


def _choose_batch_tile(B, HW, C, itemsize, *, tb_max=128, budget_bytes=24 << 20):
    """Largest 8-aligned batch tile whose double-buffered feature DMA fits."""
    per_row = HW * C * itemsize
    max_rows = (budget_bytes // (2 * per_row)) // 8 * 8
    tb = max(8, min(tb_max, max_rows))
    if B < tb:
        tb = _round_up(B, 8)
    return tb


def model_head_forward(x_nchw, w1, b1, w2, b2, *, tb_max=128):
    """Classifier head on backbone features.

    x_nchw: (B, C, H, W) backbone feature map (f32 or bf16).
    w1: (C, 1000), b1: (1000,) or (1, 1000)   [PyTorch weight transposed to (in, out)]
    w2: (1000, 4), b2: (4,) or (1, 4)
    Returns (B, 4) float32 logits.
    """
    B, C, H, W = x_nchw.shape
    HW = H * W
    n_hidden = w1.shape[1]
    n_out = w2.shape[1]
    hid_pad = _round_up(n_hidden, 128)
    out_pad = _round_up(n_out, 128)

    # Channels-last layout: (B, HW, C) so C sits on the lane axis.
    # TODO(synk): ideally the backbone emits NHWC directly; this transpose is a
    # cheap XLA op outside the kernel.
    x = jnp.transpose(x_nchw.reshape(B, C, HW), (0, 2, 1))

    tb = _choose_batch_tile(B, HW, C, x.dtype.itemsize, tb_max=tb_max)
    b_pad = _round_up(B, tb)
    if b_pad != B:
        x = jnp.pad(x, ((0, b_pad - B), (0, 0), (0, 0)))

    # Zero-pad head parameters to 128-multiples (exact, see header comment).
    w1p = _pad_to(w1.astype(jnp.float32), (C, hid_pad))
    b1p = _pad_to(jnp.reshape(b1, (1, n_hidden)).astype(jnp.float32), (1, hid_pad))
    w2p = _pad_to(w2.astype(jnp.float32), (hid_pad, out_pad))
    b2p = _pad_to(jnp.reshape(b2, (1, n_out)).astype(jnp.float32), (1, out_pad))

    x_bytes = b_pad * HW * C * x.dtype.itemsize
    param_bytes = (w1p.size + b1p.size + w2p.size + b2p.size) * 4
    out_bytes = b_pad * out_pad * 4
    cost = pl.CostEstimate(
        flops=2 * b_pad * C * hid_pad + 2 * b_pad * hid_pad * out_pad + b_pad * HW * C,
        transcendentals=0,
        bytes_accessed=x_bytes + param_bytes + out_bytes,
    )

    # VMEM: double-buffered feature tile + resident weights + small out tile.
    vmem_need = (2 * tb * HW * C * x.dtype.itemsize + param_bytes
                 + 2 * tb * out_pad * 4)
    vmem_limit = min(128 << 20, max(32 << 20, int(vmem_need * 1.5)))

    kernel = functools.partial(_head_kernel, inv_hw=1.0 / HW)

    out_padded = pl.pallas_call(
        kernel,
        out_shape=jax.ShapeDtypeStruct((b_pad, out_pad), jnp.float32),
        grid=(b_pad // tb,),
        in_specs=[
            pl.BlockSpec((tb, HW, C), lambda i: (i, 0, 0)),      # feature tile
            pl.BlockSpec((C, hid_pad), lambda i: (0, 0)),        # W1 (resident)
            pl.BlockSpec((1, hid_pad), lambda i: (0, 0)),        # b1 (resident)
            pl.BlockSpec((hid_pad, out_pad), lambda i: (0, 0)),  # W2 (resident)
            pl.BlockSpec((1, out_pad), lambda i: (0, 0)),        # b2 (resident)
        ],
        out_specs=pl.BlockSpec((tb, out_pad), lambda i: (i, 0)),
        compiler_params=pltpu.CompilerParams(
            dimension_semantics=("parallel",),
            vmem_limit_bytes=vmem_limit,
        ),
        cost_estimate=cost,
    )(x, w1p, b1p, w2p, b2p)

    return out_padded[:B, :n_out]


def _reference(x_nchw, w1, b1, w2, b2):
    pooled = jnp.mean(x_nchw.astype(jnp.float32), axis=(2, 3))
    h = pooled @ w1 + jnp.reshape(b1, (1, -1))
    h = jnp.where(h > 0, h, 0.01 * h)
    return h @ w2 + jnp.reshape(b2, (1, -1))


if __name__ == "__main__":
    # Small shapes consistent with the module: backbone features (B, C, H, W)
    # with lane-aligned channel count, head hidden width 1000, 4 classes.
    B, C, H, W = 2, 128, 8, 8
    HIDDEN, CLASSES = 1000, 4

    key = jax.random.PRNGKey(0)
    kx, k1, kb1, k2, kb2 = jax.random.split(key, 5)

    x = jax.random.normal(kx, (B, C, H, W), dtype=jnp.float32)

    # PyTorch nn.Linear stores weight as (out, in); we pass the transpose
    # (in, out) so the kernel computes x @ W.
    w1 = jax.random.normal(k1, (C, HIDDEN), dtype=jnp.float32) * 0.05
    b1 = jax.random.normal(kb1, (HIDDEN,), dtype=jnp.float32) * 0.01
    w2 = jax.random.normal(k2, (HIDDEN, CLASSES), dtype=jnp.float32) * 0.05
    b2 = jax.random.normal(kb2, (CLASSES,), dtype=jnp.float32) * 0.01

    out = model_head_forward(x, w1, b1, w2, b2)
    out = jax.block_until_ready(out)

    ref = _reference(x, w1, b1, w2, b2)
    assert out.shape == (B, CLASSES)
    assert jnp.allclose(out, ref, atol=1e-3, rtol=1e-3)

    print("KERNEL_OK")
</pallas_src>

<mosaic_0001>
module attributes {stable_mosaic.version = 11 : i64} {
  func.func @_head_kernel(%arg0: i32, %arg1: memref<8x64x128xf32, #tpu.memory_space<vmem>>, %arg2: memref<128x1024xf32, #tpu.memory_space<vmem>>, %arg3: memref<1x1024xf32, #tpu.memory_space<vmem>>, %arg4: memref<1024x128xf32, #tpu.memory_space<vmem>>, %arg5: memref<1x128xf32, #tpu.memory_space<vmem>>, %arg6: memref<8x128xf32, #tpu.memory_space<vmem>>) attributes {dimension_semantics = [#tpu.dimension_semantics<parallel>], iteration_bounds = array<i64: 1>, scalar_prefetch = 0 : i64, scratch_operands = 0 : i64, tpu.core_type = #tpu.core_type<tc>, window_params = [{transform_indices = @transform_0, window_bounds = array<i64: 8, 64, 128>}, {pipeline_mode = #tpu.pipeline_mode<synchronous>, transform_indices = @transform_1, window_bounds = array<i64: 128, 1024>}, {pipeline_mode = #tpu.pipeline_mode<synchronous>, transform_indices = @transform_2, window_bounds = array<i64: 1, 1024>}, {pipeline_mode = #tpu.pipeline_mode<synchronous>, transform_indices = @transform_3, window_bounds = array<i64: 1024, 128>}, {pipeline_mode = #tpu.pipeline_mode<synchronous>, transform_indices = @transform_4, window_bounds = array<i64: 1, 128>}, {transform_indices = @transform_5, window_bounds = array<i64: 8, 128>}]} {
    %c0 = arith.constant 0 : index
    %c0_0 = arith.constant 0 : index
    %c0_1 = arith.constant 0 : index
    %0 = vector.load %arg1[%c0, %c0_0, %c0_1] : memref<8x64x128xf32, #tpu.memory_space<vmem>>, vector<8x64x128xf32>
    %cst = arith.constant dense<0.000000e+00> : vector<8x128xf32>
    %1 = vector.multi_reduction <add>, %0, %cst [1] : vector<8x64x128xf32> to vector<8x128xf32>
    %cst_2 = arith.constant 1.562500e-02 : f32
    %2 = vector.broadcast %cst_2 : f32 to vector<8x128xf32>
    %3 = arith.mulf %1, %2 : vector<8x128xf32>
    %c0_3 = arith.constant 0 : index
    %c0_4 = arith.constant 0 : index
    %4 = vector.load %arg2[%c0_3, %c0_4] : memref<128x1024xf32, #tpu.memory_space<vmem>>, vector<128x1024xf32>
    %cst_5 = arith.constant dense<0.000000e+00> : vector<8x1024xf32>
    %5 = tpu.matmul %3, %4, %cst_5 {dimension_numbers = #tpu.dot_dimension_numbers<[1], [0], [0], [1], [0, 0, 1, 1], [], []>} : vector<8x128xf32>, vector<128x1024xf32>, vector<8x1024xf32> -> vector<8x1024xf32>
    %c0_6 = arith.constant 0 : index
    %c0_7 = arith.constant 0 : index
    %6 = vector.load %arg3[%c0_6, %c0_7] : memref<1x1024xf32, #tpu.memory_space<vmem>>, vector<1x1024xf32>
    %7 = vector.broadcast %6 : vector<1x1024xf32> to vector<8x1024xf32>
    %8 = arith.addf %5, %7 : vector<8x1024xf32>
    %cst_8 = arith.constant 0.000000e+00 : f32
    %9 = vector.broadcast %cst_8 : f32 to vector<8x1024xf32>
    %10 = arith.cmpf ogt, %8, %9 : vector<8x1024xf32>
    %cst_9 = arith.constant 0.00999999977 : f32
    %11 = vector.broadcast %cst_9 : f32 to vector<8x1024xf32>
    %12 = arith.mulf %11, %8 : vector<8x1024xf32>
    %13 = arith.select %10, %8, %12 : vector<8x1024xi1>, vector<8x1024xf32>
    %c0_10 = arith.constant 0 : index
    %c0_11 = arith.constant 0 : index
    %14 = vector.load %arg4[%c0_10, %c0_11] : memref<1024x128xf32, #tpu.memory_space<vmem>>, vector<1024x128xf32>
    %cst_12 = arith.constant dense<0.000000e+00> : vector<8x128xf32>
    %15 = tpu.matmul %13, %14, %cst_12 {dimension_numbers = #tpu.dot_dimension_numbers<[1], [0], [0], [1], [0, 0, 1, 1], [], []>} : vector<8x1024xf32>, vector<1024x128xf32>, vector<8x128xf32> -> vector<8x128xf32>
    %c0_13 = arith.constant 0 : index
    %c0_14 = arith.constant 0 : index
    %16 = vector.load %arg5[%c0_13, %c0_14] : memref<1x128xf32, #tpu.memory_space<vmem>>, vector<1x128xf32>
    %17 = vector.broadcast %16 : vector<1x128xf32> to vector<8x128xf32>
    %18 = arith.addf %15, %17 : vector<8x128xf32>
    %c0_15 = arith.constant 0 : index
    %c0_16 = arith.constant 0 : index
    %19 = vector.load %arg6[%c0_15, %c0_16] : memref<8x128xf32, #tpu.memory_space<vmem>>, vector<8x128xf32>
    tpu.vector_store %arg6[%c0_15, %c0_16], %18 {strides = array<i32>} : memref<8x128xf32, #tpu.memory_space<vmem>>, vector<8x128xf32>,
    return
  }
  func.func @transform_0(%arg0: i32) -> (i32, i32, i32) {
    %c0_i32 = arith.constant 0 : i32
    %c0_i32_0 = arith.constant 0 : i32
    %c0_i32_1 = arith.constant 0 : i32
    return %arg0, %c0_i32, %c0_i32_0 : i32, i32, i32
  }
  func.func @transform_1(%arg0: i32) -> (i32, i32) {
    %c0_i32 = arith.constant 0 : i32
    %c0_i32_0 = arith.constant 0 : i32
    %c0_i32_1 = arith.constant 0 : i32
    return %c0_i32, %c0_i32_0 : i32, i32
  }
  func.func @transform_2(%arg0: i32) -> (i32, i32) {
    %c0_i32 = arith.constant 0 : i32
    %c0_i32_0 = arith.constant 0 : i32
    %c0_i32_1 = arith.constant 0 : i32
    return %c0_i32, %c0_i32_0 : i32, i32
  }
  func.func @transform_3(%arg0: i32) -> (i32, i32) {
    %c0_i32 = arith.constant 0 : i32
    %c0_i32_0 = arith.constant 0 : i32
    %c0_i32_1 = arith.constant 0 : i32
    return %c0_i32, %c0_i32_0 : i32, i32
  }
  func.func @transform_4(%arg0: i32) -> (i32, i32) {
    %c0_i32 = arith.constant 0 : i32
    %c0_i32_0 = arith.constant 0 : i32
    %c0_i32_1 = arith.constant 0 : i32
    return %c0_i32, %c0_i32_0 : i32, i32
  }
  func.func @transform_5(%arg0: i32) -> (i32, i32) {
    %c0_i32 = arith.constant 0 : i32
    %c0_i32_0 = arith.constant 0 : i32
    return %arg0, %c0_i32 : i32, i32
  }
}

</mosaic_0001>

<bundles_post_ra>
// kernel: tpu_custom_call.1
= control target key start
LH: loop header
LB: loop body
LE: loop exit
PB: predicated region body
PF: predicated region fallthrough
CT: control target
= control target key end

     0   :  { %10 = vsyncpa [#allocation3], 0  ;;  %s1858_s0 = inlined_call_operand.hbm [shape: f32[8,64,128], index: 0, kind: input, shape index: {}]   ;;  %s1859_s1 = inlined_call_operand.hbm [shape: f32[128,1024], index: 1, kind: input, shape index: {}]   ;;  %s1860_s2 = inlined_call_operand.hbm [shape: f32[1,1024], index: 2, kind: input, shape index: {}]   ;;  %s1861_s3 = inlined_call_operand.hbm [shape: f32[1024,128], index: 3, kind: input, shape index: {}]   ;;  %s1862_s4 = inlined_call_operand.vmem [shape: f32[1,128], index: 4, kind: input, shape index: {}]   ;;  %s1863_s5 = inlined_call_operand.hbm [shape: f32[8,128], index: 5, kind: output, shape index: {}]  }
   0x1   :  { %11 = vsyncpa [#allocation6], 0 }
   0x2   :  { %12 = vsyncpa [#allocation9], 0 }
   0x3   :  { %13 = vsyncpa [#allocation4], 0  ;;  %s1709_s18 = smov [#allocation5]   ;;  %s1591_s22 = scalar_lea.hbm %s1859_s1, 16384 }
   0x4   :  { %s31_s19 = sshll.u32 %s1709_s18, 4  ;;  %p1592_p0 = scmp.ne.s32.totalorder %s1859_s1, %s1591_s22  ;;  %s32_s19 = int_to_ptr.vmem [resolvable:$true] %s31_s19 }
   0x5   :  { %p1595_p1 = scmp.lt.u32.totalorder %s1591_s22, %s1859_s1 }
   0x7   :  { %p1597_p2 = pnand %p1595_p1, %p1592_p0 }
   0x9   :  { %1600 = shalt.err (!%p1597_p2)
}
   0xa   :  { %s1601_s27 = scalar_lea.vmem %s32_s19, 16384  ;;  %p1606_p4 = scmp.lt.s32.totalorder %s32_s19, %s32_s19 }
   0xb   :  { %p1602_p3 = scmp.ne.s32.totalorder %s32_s19, %s1601_s27  ;;  %p1607_p5 = scmp.lt.s32.totalorder %s1601_s27, %s1601_s27 }
   0xd   :  { %p1608_p6 = por %p1607_p5, %p1606_p4 }
   0xf   :  { %p1609_p7 = pnand %p1608_p6, %p1602_p3 }
  0x11   :  { %1612 = shalt.err (!%p1609_p7)
}
  0x12   :  { %s1710_s28 = smov 1024   ;;  %s1711_s29 = smov 64  }
  0x13   :  { %37 = dma.hbm_to_vmem [thread:$0]  %s1859_s1, 16384, %s32_s19, [#allocation6], %s1710_s28, %s1710_s28, %s1711_s29  }
  0x14   :  { %s1712_s7 = smov [#allocation2]   ;;  %s1613_s11 = scalar_lea.hbm %s1858_s0, 8192 }
  0x15   :  { %s19_s8 = sshll.u32 %s1712_s7, 4  ;;  %p1614_p8 = scmp.ne.s32.totalorder %s1858_s0, %s1613_s11  ;;  %s20_s8 = int_to_ptr.vmem [resolvable:$true] %s19_s8 }
  0x16   :  { %p1617_p9 = scmp.lt.u32.totalorder %s1613_s11, %s1858_s0 }
  0x18   :  { %p1619_p10 = pnand %p1617_p9, %p1614_p8 }
  0x1a   :  { %1622 = shalt.err (!%p1619_p10)
}
  0x1b   :  { %s1623_s16 = scalar_lea.vmem %s20_s8, 8192  ;;  %p1628_p12 = scmp.lt.s32.totalorder %s20_s8, %s20_s8 }
  0x1c   :  { %p1624_p11 = scmp.ne.s32.totalorder %s20_s8, %s1623_s16  ;;  %p1629_p13 = scmp.lt.s32.totalorder %s1623_s16, %s1623_s16 }
  0x1e   :  { %p1630_p0 = por %p1629_p13, %p1628_p12 }
  0x20   :  { %p1631_p1 = pnand %p1630_p0, %p1624_p11 }
  0x22   :  { %1634 = shalt.err (!%p1631_p1)
}
  0x23   :  { %s1713_s1 = smov 128   ;;  %s1714_s17 = smov 8  }
  0x24   :  { %25 = dma.hbm_to_vmem [thread:$0]  %s1858_s0, 8192, %s20_s8, [#allocation3], %s1713_s1, %s1713_s1, %s1714_s17  }
  0x25   :  { %s1715_s20 = smov [#allocation7]   ;;  %s1716_s22 = smov [#allocation8]  }
  0x26   :  { %s44_s21 = sshll.u32 %s1715_s20, 4  ;;  %s53_s23 = sshll.u32 %s1716_s22, 4  ;;  %s45_s21 = int_to_ptr.vmem [resolvable:$true] %s44_s21  ;;  %s1776_s23 = int_to_ptr.vmem [resolvable:$true] %s53_s23 }
  0x27   :  { %s1635_s26 = scalar_lea.hbm %s1860_s2, 128 }
  0x28   :  { %p1636_p2 = scmp.ne.s32.totalorder %s1860_s2, %s1635_s26  ;;  %p1639_p3 = scmp.lt.u32.totalorder %s1635_s26, %s1860_s2 }
  0x2a   :  { %p1641_p4 = pnand %p1639_p3, %p1636_p2 }
  0x2c   :  { %1644 = shalt.err (!%p1641_p4)
}
  0x2d   :  { %s1645_s0 = scalar_lea.vmem %s45_s21, 128  ;;  %p1650_p6 = scmp.lt.s32.totalorder %s45_s21, %s45_s21 }
  0x2e   :  { %p1646_p5 = scmp.ne.s32.totalorder %s45_s21, %s1645_s0  ;;  %p1651_p7 = scmp.lt.s32.totalorder %s1645_s0, %s1645_s0 }
  0x30   :  { %p1652_p8 = por %p1651_p7, %p1650_p6 }
  0x32   :  { %p1653_p9 = pnand %p1652_p8, %p1646_p5 }
  0x34   :  { %1656 = shalt.err (!%p1653_p9)
}
  0x35   :  { %47 = dma.hbm_to_vmem [thread:$0]  %s1860_s2, 128, %s45_s21, [#allocation6]  }
  0x36   :  { %s1657_s10 = scalar_lea.hbm %s1861_s3, 16384 }
  0x37   :  { %p1658_p10 = scmp.ne.s32.totalorder %s1861_s3, %s1657_s10  ;;  %p1661_p11 = scmp.lt.u32.totalorder %s1657_s10, %s1861_s3 }
  0x39   :  { %p1663_p12 = pnand %p1661_p11, %p1658_p10 }
  0x3b   :  { %1666 = shalt.err (!%p1663_p12)
}
  0x3c   :  { %s1667_s15 = scalar_lea.vmem %s1776_s23, 16384  ;;  %p1672_p0 = scmp.lt.s32.totalorder %s1776_s23, %s1776_s23 }
  0x3d   :  { %p1668_p13 = scmp.ne.s32.totalorder %s1776_s23, %s1667_s15  ;;  %p1673_p1 = scmp.lt.s32.totalorder %s1667_s15, %s1667_s15 }
  0x3f   :  { %p1674_p2 = por %p1673_p1, %p1672_p0 }
  0x41   :  { %p1675_p3 = pnand %p1674_p2, %p1668_p13 }
  0x43   :  { %1678 = shalt.err (!%p1675_p3)
}
  0x44   :  { %59 = dma.hbm_to_vmem [thread:$0]  %s1861_s3, 16384, %s1776_s23, [#allocation9], %s1713_s1, %s1713_s1, %s1714_s17  }
  0x45   :  { %1701 = dma.done.wait [#allocation3], 8192  }
  0x46   :  { %1702 = vsyncadd [#allocation3], 4294959104 }
  0x47   :  { %1703 = dma.done.wait [#allocation6], 16512  }
  0x48   :  { %1704 = vsyncadd [#allocation6], 4294950784 }
  0x49   :  { %1705 = dma.done.wait [#allocation9], 16384  }
  0x4a   :  { %1706 = vsyncadd [#allocation9], 4294950912  ;;  %v1717_v0 = vmov 0.0   ;;  %v251_v1 = vld [vmem:[#allocation5 + $0x8] sm:$0xff]  ;;  %v253_v3 = vld [vmem:[#allocation5 + $0x18] sm:$0xff]  ;;  %vm428_vm0 = vcmask 1041409  }
  0x4b   :  { %507 = vmatprep.mubr.f32.mxu0 %v1717_v0  ;;  %578 = vmatprep.mubr.f32.mxu1 %v1717_v0  ;;  %v259_v2 = vld [vmem:[#allocation5 + $0x48] sm:$0xff]  ;;  %v261_v5 = vld [vmem:[#allocation5 + $0x58] sm:$0xff]  ;;  %v250_v6 = vld [vmem:[#allocation5] sm:$0xff]  ;;  %vm430_vm1 = vcmask 1042434   ;;  %vm432_vm2 = vcmask 1043459   ;;  %vm434_vm3 = vcmask 1044484  }
  0x4c   :  { %v1325_v4 = vpack.c.bf16 %v259_v2, %v251_v1  ;;  %v258_v7 = vld [vmem:[#allocation5 + $0x40] sm:$0xff]  ;;  %v1357_v8 = vpack.c.bf16 %v261_v5, %v253_v3  ;;  %v252_v10 = vld [vmem:[#allocation5 + $0x10] sm:$0xff]  ;;  %v267_v12 = vld [vmem:[#allocation5 + $0x88] sm:$0xff]  ;;  %vm436_vm4 = vcmask 1045509   ;;  %vm438_vm5 = vcmask 1046534   ;;  %s1718_s17 = smov [#allocation10]  }
  0x4d   :  { %v1327_v9 = vpack.c.bf16 %v258_v7, %v250_v6  ;;  %v260_v11 = vld [vmem:[#allocation5 + $0x50] sm:$0xff]  ;;  %v275_v14 = vld [vmem:[#allocation5 + $0xc8] sm:$0xff]  ;;  %v269_v15 = vld [vmem:[#allocation5 + $0x98] sm:$0xff]  ;;  %vm440_vm6 = vcmask 1047559   ;;  %s1173_s18 = sshll.u32 %s1718_s17, 4  ;;  %s1174_s18 = int_to_ptr.vmem [resolvable:$true] %s1173_s18 }
  0x4e   :  { %1326 = vmatprep.subr.bf16.mxu0 %v1325_v4  ;;  %v1359_v13 = vpack.c.bf16 %v260_v11, %v252_v10  ;;  %v277_v16 = vld [vmem:[#allocation5 + $0xd8] sm:$0xff]  ;;  %1358 = vmatprep.subr.bf16.mxu1 %v1357_v8  ;;  %v1329_v17 = vpack.c.bf16 %v275_v14, %v267_v12  ;;  %v266_v19 = vld [vmem:[#allocation5 + $0x80] sm:$0xff]  ;;  %v268_v21 = vld [vmem:[#allocation5 + $0x90] sm:$0xff]  ;;  %s1679_s19 = scalar_lea.vmem %s1174_s18, 128  ;;  %p1684_p5 = scmp.lt.s32.totalorder %s1174_s18, %s1174_s18 }
  0x4f   :  { %1328 = vmatpush1.bf16.msra.mxu0 %v1327_v9  ;;  %v1361_v18 = vpack.c.bf16 %v277_v16, %v269_v15  ;;  %v274_v20 = vld [vmem:[#allocation5 + $0xc0] sm:$0xff]  ;;  %v276_v23 = vld [vmem:[#allocation5 + $0xd0] sm:$0xff]  ;;  %v283_v24 = vld [vmem:[#allocation5 + $0x108] sm:$0xff]  ;;  %p1680_p4 = scmp.ne.s32.totalorder %s1174_s18, %s1679_s19  ;;  %p1685_p6 = scmp.lt.s32.totalorder %s1679_s19, %s1679_s19 }
  0x50   :  { %1360 = vmatpush1.bf16.msra.mxu1 %v1359_v13  ;;  %v1331_v22 = vpack.c.bf16 %v274_v20, %v266_v19  ;;  %v291_v25 = vld [vmem:[#allocation5 + $0x148] sm:$0xff]  ;;  %1330 = vmatprep.subr.bf16.mxu0 %v1329_v17  ;;  %v1363_v26 = vpack.c.bf16 %v276_v23, %v268_v21  ;;  %v285_v28 = vld [vmem:[#allocation5 + $0x118] sm:$0xff]  ;;  %v282_v30 = vld [vmem:[#allocation5 + $0x100] sm:$0xff] }
  0x51   :  { %1362 = vmatprep.subr.bf16.mxu1 %v1361_v18  ;;  %v1333_v27 = vpack.c.bf16 %v291_v25, %v283_v24  ;;  %v293_v29 = vld [vmem:[#allocation5 + $0x158] sm:$0xff]  ;;  %v290_v32 = vld [vmem:[#allocation5 + $0x140] sm:$0xff]  ;;  %v284_v33 = vld [vmem:[#allocation5 + $0x110] sm:$0xff]  ;;  %p1686_p7 = por %p1685_p6, %p1684_p5 }
  0x52   :  { %v1365_v31 = vpack.c.bf16 %v293_v29, %v285_v28  ;;  %v292_v34 = vld [vmem:[#allocation5 + $0x150] sm:$0xff]  ;;  %v1335_v35 = vpack.c.bf16 %v290_v32, %v282_v30  ;;  %v299_v36 = vld [vmem:[#allocation5 + $0x188] sm:$0xff]  ;;  %v301_v38 = vld [vmem:[#allocation5 + $0x198] sm:$0xff] }
  0x53   :  { %1332 = vmatpush1.bf16.msra.mxu0 %v1331_v22  ;;  %v307_v37 = vld [vmem:[#allocation5 + $0x1c8] sm:$0xff]  ;;  %v1367_v39 = vpack.c.bf16 %v292_v34, %v284_v33  ;;  %v309_v41 = vld [vmem:[#allocation5 + $0x1d8] sm:$0xff]  ;;  %v298_v42 = vld [vmem:[#allocation5 + $0x180] sm:$0xff]  ;;  %p1687_p8 = pnand %p1686_p7, %p1680_p4 }
  0x54   :  { %1364 = vmatpush1.bf16.msra.mxu1 %v1363_v26  ;;  %1334 = vmatprep.subr.bf16.mxu0 %v1333_v27  ;;  %v1337_v40 = vpack.c.bf16 %v307_v37, %v299_v36  ;;  %v306_v43 = vld [vmem:[#allocation5 + $0x1c0] sm:$0xff]  ;;  %v1369_v44 = vpack.c.bf16 %v309_v41, %v301_v38  ;;  %v300_v45 = vld [vmem:[#allocation5 + $0x190] sm:$0xff]  ;;  %v315_v47 = vld [vmem:[#allocation5 + $0x208] sm:$0xff] }
  0x55   :  { %1366 = vmatprep.subr.bf16.mxu1 %v1365_v31  ;;  %v308_v46 = vld [vmem:[#allocation5 + $0x1d0] sm:$0xff]  ;;  %v323_v48 = vld [vmem:[#allocation5 + $0x248] sm:$0xff]  ;;  %v317_v49 = vld [vmem:[#allocation5 + $0x218] sm:$0xff]  ;;  %v1339_v51 = vpack.c.bf16 %v306_v43, %v298_v42 }
  0x56   :  { %v325_v50 = vld [vmem:[#allocation5 + $0x258] sm:$0xff]  ;;  %v1371_v52 = vpack.c.bf16 %v308_v46, %v300_v45  ;;  %v1341_v53 = vpack.c.bf16 %v323_v48, %v315_v47  ;;  %v314_v54 = vld [vmem:[#allocation5 + $0x200] sm:$0xff]  ;;  %v316_v56 = vld [vmem:[#allocation5 + $0x210] sm:$0xff] }
  0x57   :  { %1336 = vmatpush1.bf16.msra.mxu0 %v1335_v35  ;;  %v322_v55 = vld [vmem:[#allocation5 + $0x240] sm:$0xff]  ;;  %v1373_v57 = vpack.c.bf16 %v325_v50, %v317_v49  ;;  %v324_v58 = vld [vmem:[#allocation5 + $0x250] sm:$0xff]  ;;  %v331_v59 = vld [vmem:[#allocation5 + $0x288] sm:$0xff] }
  0x58   :  { %1368 = vmatpush1.bf16.msra.mxu1 %v1367_v39  ;;  %1338 = vmatprep.subr.bf16.mxu0 %v1337_v40  ;;  %v339_v60 = vld [vmem:[#allocation5 + $0x2c8] sm:$0xff]  ;;  %v333_v61 = vld [vmem:[#allocation5 + $0x298] sm:$0xff]  ;;  %v1343_v63 = vpack.c.bf16 %v322_v55, %v314_v54  ;;  %v1375_v1 = vpack.c.bf16 %v324_v58, %v316_v56  ;;  %v330_v3 = vld [vmem:[#allocation5 + $0x280] sm:$0xff] }
  0x59   :  { %1370 = vmatprep.subr.bf16.mxu1 %v1369_v44  ;;  %v341_v62 = vld [vmem:[#allocation5 + $0x2d8] sm:$0xff]  ;;  %v1345_v2 = vpack.c.bf16 %v339_v60, %v331_v59  ;;  %v338_v4 = vld [vmem:[#allocation5 + $0x2c0] sm:$0xff]  ;;  %v332_v5 = vld [vmem:[#allocation5 + $0x290] sm:$0xff] }
  0x5a   :  { %v1377_v6 = vpack.c.bf16 %v341_v62, %v333_v61  ;;  %v340_v7 = vld [vmem:[#allocation5 + $0x2d0] sm:$0xff]  ;;  %v347_v8 = vld [vmem:[#allocation5 + $0x308] sm:$0xff]  ;;  %v349_v10 = vld [vmem:[#allocation5 + $0x318] sm:$0xff]  ;;  %v1347_v12 = vpack.c.bf16 %v338_v4, %v330_v3 }
  0x5b   :  { %1340 = vmatpush1.bf16.msra.mxu0 %v1339_v51  ;;  %v355_v9 = vld [vmem:[#allocation5 + $0x348] sm:$0xff]  ;;  %v357_v11 = vld [vmem:[#allocation5 + $0x358] sm:$0xff]  ;;  %v346_v13 = vld [vmem:[#allocation5 + $0x300] sm:$0xff]  ;;  %v1379_v16 = vpack.c.bf16 %v340_v7, %v332_v5 }
  0x5c   :  { %1372 = vmatpush1.bf16.msra.mxu1 %v1371_v52  ;;  %1342 = vmatprep.subr.bf16.mxu0 %v1341_v53  ;;  %v354_v14 = vld [vmem:[#allocation5 + $0x340] sm:$0xff]  ;;  %v348_v15 = vld [vmem:[#allocation5 + $0x310] sm:$0xff]  ;;  %v1349_v17 = vpack.c.bf16 %v355_v9, %v347_v8  ;;  %v363_v19 = vld [vmem:[#allocation5 + $0x388] sm:$0xff]  ;;  %v1381_v21 = vpack.c.bf16 %v357_v11, %v349_v10 }
  0x5d   :  { %1374 = vmatprep.subr.bf16.mxu1 %v1373_v57  ;;  %v356_v18 = vld [vmem:[#allocation5 + $0x350] sm:$0xff]  ;;  %v371_v20 = vld [vmem:[#allocation5 + $0x3c8] sm:$0xff]  ;;  %v365_v22 = vld [vmem:[#allocation5 + $0x398] sm:$0xff]  ;;  %v1351_v29 = vpack.c.bf16 %v354_v14, %v346_v13 }
  0x5e   :  { %v373_v23 = vld [vmem:[#allocation5 + $0x3d8] sm:$0xff]  ;;  %v74_v24 = vld [vmem:[#allocation2] sm:$0xff]  ;;  %v75_v27 = vld [vmem:[#allocation2 + $0x8] sm:$0xff]  ;;  %v1383_v34 = vpack.c.bf16 %v356_v18, %v348_v15  ;;  %v1353_v35 = vpack.c.bf16 %v371_v20, %v363_v19 }
  0x5f   :  { %1344 = vmatpush1.bf16.msra.mxu0 %v1343_v63  ;;  %v362_v25 = vld [vmem:[#allocation5 + $0x380] sm:$0xff]  ;;  %v76_v28 = vld [vmem:[#allocation2 + $0x10] sm:$0xff]  ;;  %v255_v32 = vld [vmem:[#allocation5 + $0x28] sm:$0xff]  ;;  %v138_v33 = vadd.f32 %v75_v27, %v74_v24  ;;  %v1385_v39 = vpack.c.bf16 %v373_v23, %v365_v22 }
  0x60   :  { %1376 = vmatpush1.bf16.msra.mxu1 %v1375_v1  ;;  %1346 = vmatprep.subr.bf16.mxu0 %v1345_v2  ;;  %v370_v26 = vld [vmem:[#allocation5 + $0x3c0] sm:$0xff]  ;;  %v364_v30 = vld [vmem:[#allocation5 + $0x390] sm:$0xff]  ;;  %v77_v36 = vld [vmem:[#allocation2 + $0x18] sm:$0xff] }
  0x61   :  { %1378 = vmatprep.subr.bf16.mxu1 %v1377_v6  ;;  %v372_v31 = vld [vmem:[#allocation5 + $0x3d0] sm:$0xff]  ;;  %v82_v37 = vld [vmem:[#allocation2 + $0x40] sm:$0xff]  ;;  %v83_v38 = vld [vmem:[#allocation2 + $0x48] sm:$0xff]  ;;  %v139_v43 = vadd.f32 %v138_v33, %v76_v28  ;;  %v1355_v48 = vpack.c.bf16 %v370_v26, %v362_v25 }
  0x62   :  { %v263_v40 = vld [vmem:[#allocation5 + $0x68] sm:$0xff]  ;;  %v257_v41 = vld [vmem:[#allocation5 + $0x38] sm:$0xff]  ;;  %v84_v42 = vld [vmem:[#allocation2 + $0x50] sm:$0xff]  ;;  %v151_v44 = vadd.f32 %v83_v38, %v82_v37  ;;  %v1387_v54 = vpack.c.bf16 %v372_v31, %v364_v30 }
  0x63   :  { %1348 = vmatpush1.bf16.msra.mxu0 %v1347_v12  ;;  %v265_v45 = vld [vmem:[#allocation5 + $0x78] sm:$0xff]  ;;  %v78_v46 = vld [vmem:[#allocation2 + $0x20] sm:$0xff]  ;;  %v91_v50 = vld [vmem:[#allocation2 + $0x88] sm:$0xff]  ;;  %v140_v52 = vadd.f32 %v139_v43, %v77_v36  ;;  %v1389_v55 = vpack.c.bf16 %v263_v40, %v255_v32 }
  0x64   :  { %1380 = vmatpush1.bf16.msra.mxu1 %v1379_v16  ;;  %1350 = vmatprep.subr.bf16.mxu0 %v1349_v17  ;;  %v85_v47 = vld [vmem:[#allocation2 + $0x58] sm:$0xff]  ;;  %v90_v49 = vld [vmem:[#allocation2 + $0x80] sm:$0xff]  ;;  %v92_v51 = vld [vmem:[#allocation2 + $0x90] sm:$0xff]  ;;  %v152_v53 = vadd.f32 %v151_v44, %v84_v42  ;;  %v1421_v59 = vpack.c.bf16 %v265_v45, %v257_v41 }
  0x65   :  { %1382 = vmatprep.subr.bf16.mxu1 %v1381_v21  ;;  %v79_v56 = vld [vmem:[#allocation2 + $0x28] sm:$0xff]  ;;  %v86_v57 = vld [vmem:[#allocation2 + $0x60] sm:$0xff]  ;;  %v164_v58 = vadd.f32 %v91_v50, %v90_v49  ;;  %v80_v60 = vld [vmem:[#allocation2 + $0x30] sm:$0xff]  ;;  %v141_v63 = vadd.f32 %v140_v52, %v78_v46 }
  0x66   :  { %v93_v61 = vld [vmem:[#allocation2 + $0x98] sm:$0xff]  ;;  %v98_v62 = vld [vmem:[#allocation2 + $0xc0] sm:$0xff]  ;;  %v153_v1 = vadd.f32 %v152_v53, %v85_v47  ;;  %v87_v2 = vld [vmem:[#allocation2 + $0x68] sm:$0xff] }
  0x67   :  { %1352 = vmatpush1.bf16.msra.mxu0 %v1351_v29  ;;  %v99_v3 = vld [vmem:[#allocation2 + $0xc8] sm:$0xff]  ;;  %v100_v4 = vld [vmem:[#allocation2 + $0xd0] sm:$0xff]  ;;  %v165_v5 = vadd.f32 %v164_v58, %v92_v51  ;;  %v81_v6 = vld [vmem:[#allocation2 + $0x38] sm:$0xff]  ;;  %v142_v9 = vadd.f32 %v141_v63, %v79_v56 }
  0x68   :  { %1384 = vmatpush1.bf16.msra.mxu1 %v1383_v34  ;;  %1354 = vmatprep.subr.bf16.mxu0 %v1353_v35  ;;  %v88_v7 = vld [vmem:[#allocation2 + $0x70] sm:$0xff]  ;;  %v94_v8 = vld [vmem:[#allocation2 + $0xa0] sm:$0xff]  ;;  %v154_v10 = vadd.f32 %v153_v1, %v86_v57  ;;  %v177_v11 = vadd.f32 %v99_v3, %v98_v62  ;;  %v101_v12 = vld [vmem:[#allocation2 + $0xd8] sm:$0xff] }
  0x69   :  { %1386 = vmatprep.subr.bf16.mxu1 %v1385_v39  ;;  %v106_v13 = vld [vmem:[#allocation2 + $0x100] sm:$0xff]  ;;  %v107_v14 = vld [vmem:[#allocation2 + $0x108] sm:$0xff]  ;;  %v166_v15 = vadd.f32 %v165_v5, %v93_v61  ;;  %v89_v16 = vld [vmem:[#allocation2 + $0x78] sm:$0xff]  ;;  %v143_v19 = vadd.f32 %v142_v9, %v80_v60 }
  0x6a   :  { %v95_v17 = vld [vmem:[#allocation2 + $0xa8] sm:$0xff]  ;;  %v108_v18 = vld [vmem:[#allocation2 + $0x110] sm:$0xff]  ;;  %v155_v20 = vadd.f32 %v154_v10, %v87_v2  ;;  %v178_v21 = vadd.f32 %v177_v11, %v100_v4  ;;  %v190_v22 = vadd.f32 %v107_v14, %v106_v13  ;;  %v102_v24 = vld [vmem:[#allocation2 + $0xe0] sm:$0xff] }
  0x6b   :  { %1356 = vmatpush1.bf16.msra.mxu0 %v1355_v48  ;;  %v96_v23 = vld [vmem:[#allocation2 + $0xb0] sm:$0xff]  ;;  %v109_v25 = vld [vmem:[#allocation2 + $0x118] sm:$0xff]  ;;  %v167_v26 = vadd.f32 %v166_v15, %v94_v8  ;;  %v114_v27 = vld [vmem:[#allocation2 + $0x140] sm:$0xff]  ;;  %v144_v30 = vadd.f32 %v143_v19, %v81_v6 }
  0x6c   :  { %1388 = vmatpush1.bf16.msra.mxu1 %v1387_v54  ;;  %1390 = vmatprep.subr.bf16.mxu0 %v1389_v55  ;;  %v115_v28 = vld [vmem:[#allocation2 + $0x148] sm:$0xff]  ;;  %v116_v29 = vld [vmem:[#allocation2 + $0x150] sm:$0xff]  ;;  %v156_v31 = vadd.f32 %v155_v20, %v88_v7  ;;  %v179_v32 = vadd.f32 %v178_v21, %v101_v12  ;;  %v191_v33 = vadd.f32 %v190_v22, %v108_v18  ;;  %v110_v35 = vld [vmem:[#allocation2 + $0x120] sm:$0xff] }
  0x6d   :  { %1422 = vmatprep.subr.bf16.mxu1 %v1421_v59  ;;  %v103_v34 = vld [vmem:[#allocation2 + $0xe8] sm:$0xff]  ;;  %v168_v36 = vadd.f32 %v167_v26, %v95_v17  ;;  %v203_v37 = vadd.f32 %v115_v28, %v114_v27  ;;  %v97_v38 = vld [vmem:[#allocation2 + $0xb8] sm:$0xff]  ;;  %v122_v40 = vld [vmem:[#allocation2 + $0x180] sm:$0xff]  ;;  %v145_v41 = vrot.slane %v144_v30, 4 }
  0x6e   :  { %v117_v39 = vld [vmem:[#allocation2 + $0x158] sm:$0xff]  ;;  %v157_v42 = vadd.f32 %v156_v31, %v89_v16  ;;  %v180_v43 = vadd.f32 %v179_v32, %v102_v24  ;;  %v192_v44 = vadd.f32 %v191_v33, %v109_v25  ;;  %v104_v45 = vld [vmem:[#allocation2 + $0xf0] sm:$0xff]  ;;  %v111_v46 = vld [vmem:[#allocation2 + $0x128] sm:$0xff] }
  0x6f   :  { %v123_v47 = vld [vmem:[#allocation2 + $0x188] sm:$0xff]  ;;  %v169_v48 = vadd.f32 %v168_v36, %v96_v23  ;;  %v204_v49 = vadd.f32 %v203_v37, %v116_v29  ;;  %v105_v50 = vld [vmem:[#allocation2 + $0xf8] sm:$0xff]  ;;  %v118_v51 = vld [vmem:[#allocation2 + $0x160] sm:$0xff]  ;;  %v146_v53 = vadd.f32 %v145_v41, %v144_v30 }
  0x70   :  { %v124_v52 = vld [vmem:[#allocation2 + $0x190] sm:$0xff]  ;;  %v158_v54 = vrot.slane %v157_v42, 4  ;;  %v181_v55 = vadd.f32 %v180_v43, %v103_v34  ;;  %v193_v56 = vadd.f32 %v192_v44, %v110_v35  ;;  %v130_v58 = vld [vmem:[#allocation2 + $0x1c0] sm:$0xff]  ;;  %v131_v59 = vld [vmem:[#allocation2 + $0x1c8] sm:$0xff]  ;;  %v216_v62 = vadd.f32 %v123_v47, %v122_v40 }
  0x71   :  { %v112_v57 = vld [vmem:[#allocation2 + $0x130] sm:$0xff]  ;;  %v170_v60 = vadd.f32 %v169_v48, %v97_v38  ;;  %v205_v61 = vadd.f32 %v204_v49, %v117_v39  ;;  %v119_v63 = vld [vmem:[#allocation2 + $0x168] sm:$0xff]  ;;  %v125_v1 = vld [vmem:[#allocation2 + $0x198] sm:$0xff]  ;;  %v147_v3 = vrot.slane %v146_v53, 2  ;;  %v229_v11 = vadd.f32 %v131_v59, %v130_v58 }
  0x72   :  { %v132_v2 = vld [vmem:[#allocation2 + $0x1d0] sm:$0xff]  ;;  %v159_v4 = vadd.f32 %v158_v54, %v157_v42  ;;  %v182_v5 = vadd.f32 %v181_v55, %v104_v45  ;;  %v194_v6 = vadd.f32 %v193_v56, %v111_v46  ;;  %v113_v7 = vld [vmem:[#allocation2 + $0x138] sm:$0xff]  ;;  %v217_v10 = vadd.f32 %v216_v62, %v124_v52  ;;  %v126_v13 = vld [vmem:[#allocation2 + $0x1a0] sm:$0xff] }
  0x73   :  { %v171_v8 = vrot.slane %v170_v60, 4  ;;  %v206_v9 = vadd.f32 %v205_v61, %v118_v51  ;;  %v120_v12 = vld [vmem:[#allocation2 + $0x170] sm:$0xff]  ;;  %v133_v14 = vld [vmem:[#allocation2 + $0x1d8] sm:$0xff]  ;;  %v148_v15 = vadd.f32 %v147_v3, %v146_v53  ;;  %v230_v22 = vadd.f32 %v229_v11, %v132_v2  ;;  %v127_v24 = vld [vmem:[#allocation2 + $0x1a8] sm:$0xff] }
  0x74   :  { %v160_v16 = vrot.slane %v159_v4, 2  ;;  %v183_v17 = vadd.f32 %v182_v5, %v105_v50  ;;  %v195_v18 = vadd.f32 %v194_v6, %v112_v57  ;;  %v218_v21 = vadd.f32 %v217_v10, %v125_v1  ;;  %v121_v23 = vld [vmem:[#allocation2 + $0x178] sm:$0xff]  ;;  %v134_v25 = vld [vmem:[#allocation2 + $0x1e0] sm:$0xff]  ;;  %v128_v34 = vld [vmem:[#allocation2 + $0x1b0] sm:$0xff] }
  0x75   :  { %v172_v19 = vadd.f32 %v171_v8, %v170_v60  ;;  %v207_v20 = vadd.f32 %v206_v9, %v119_v63  ;;  %v149_v26 = vrot.slane %v148_v15, 1  ;;  %v231_v33 = vadd.f32 %v230_v22, %v133_v14  ;;  %v135_v35 = vld [vmem:[#allocation2 + $0x1e8] sm:$0xff]  ;;  %v129_v44 = vld [vmem:[#allocation2 + $0x1b8] sm:$0xff]  ;;  %v136_v45 = vld [vmem:[#allocation2 + $0x1f0] sm:$0xff] }
  0x76   :  { %v161_v27 = vadd.f32 %v160_v16, %v159_v4  ;;  %v184_v28 = vrot.slane %v183_v17, 4  ;;  %v196_v29 = vadd.f32 %v195_v18, %v113_v7  ;;  %v219_v32 = vadd.f32 %v218_v21, %v126_v13  ;;  %v137_v54 = vld [vmem:[#allocation2 + $0x1f8] sm:$0xff] }
  0x77   :  { %v173_v30 = vrot.slane %v172_v19, 2  ;;  %v208_v31 = vadd.f32 %v207_v20, %v120_v12  ;;  %v150_v36 = vadd.f32 %v149_v26, %v148_v15  ;;  %v232_v43 = vadd.f32 %v231_v33, %v134_v25  ;;  %v271_v33 = vld [vmem:[#allocation5 + $0xa8] sm:$0xff] }
  0x78   :  { %v162_v37 = vrot.slane %v161_v27, 1  ;;  %v185_v38 = vadd.f32 %v184_v28, %v183_v17  ;;  %v197_v39 = vrot.slane %v196_v29, 4  ;;  %v220_v42 = vadd.f32 %v219_v32, %v127_v24  ;;  %v254_v28 = vld [vmem:[#allocation5 + $0x20] sm:$0xff]  ;;  %v264_v32 = vld [vmem:[#allocation5 + $0x70] sm:$0xff] }
  0x79   :  { %v174_v40 = vadd.f32 %v173_v30, %v172_v19  ;;  %v209_v41 = vadd.f32 %v208_v31, %v121_v23  ;;  %v242_v49 = vmul.f32 0.015625, %v150_v36  ;;  %v233_v53 = vadd.f32 %v232_v43, %v135_v35  ;;  %v256_v31 = vld [vmem:[#allocation5 + $0x30] sm:$0xff]  ;;  %v279_v36 = vld [vmem:[#allocation5 + $0xe8] sm:$0xff]  ;;  %v270_v43 = vld [vmem:[#allocation5 + $0xa0] sm:$0xff] }
  0x7a   :  { %v163_v46 = vadd.f32 %v162_v37, %v161_v27  ;;  %v186_v47 = vrot.slane %v185_v38, 2  ;;  %v198_v48 = vadd.f32 %v197_v39, %v196_v29  ;;  %v221_v52 = vadd.f32 %v220_v42, %v128_v34  ;;  %v262_v29 = vld [vmem:[#allocation5 + $0x60] sm:$0xff]  ;;  %v273_v37 = vld [vmem:[#allocation5 + $0xb8] sm:$0xff] }
  0x7b   :  { %v175_v50 = vrot.slane %v174_v40, 1  ;;  %v210_v51 = vrot.slane %v209_v41, 4  ;;  %v234_v61 = vadd.f32 %v233_v53, %v136_v45  ;;  %v1423_v42 = vpack.c.bf16 %v264_v32, %v256_v31  ;;  %v297_v53 = vld [vmem:[#allocation5 + $0x178] sm:$0xff]  ;;  %v336_v32 = vld [vmem:[#allocation5 + $0x2b0] sm:$0xff] }
  0x7c   :  { %v187_v55 = vadd.f32 %v186_v47, %v185_v38  ;;  %v199_v56 = vrot.slane %v198_v48, 2  ;;  %v243_v57 = vmul.f32 0.015625, %v163_v46  ;;  %v222_v60 = vadd.f32 %v221_v52, %v129_v44  ;;  %v281_v38 = vld [vmem:[#allocation5 + $0xf8] sm:$0xff]  ;;  %v278_v44 = vld [vmem:[#allocation5 + $0xe0] sm:$0xff]  ;;  %v272_v47 = vld [vmem:[#allocation5 + $0xb0] sm:$0xff] }
  0x7d   :  { %v176_v58 = vadd.f32 %v175_v50, %v174_v40  ;;  %v211_v59 = vadd.f32 %v210_v51, %v209_v41  ;;  %v235_v4 = vadd.f32 %v234_v61, %v137_v54  ;;  %v1391_v41 = vpack.c.bf16 %v262_v29, %v254_v28  ;;  %v295_v51 = vld [vmem:[#allocation5 + $0x168] sm:$0xff]  ;;  %v289_v52 = vld [vmem:[#allocation5 + $0x138] sm:$0xff]  ;;  %v296_v61 = vld [vmem:[#allocation5 + $0x170] sm:$0xff] }
  0x7e   :  { %v188_v62 = vrot.slane %v187_v55, 1  ;;  %v200_v63 = vadd.f32 %v199_v56, %v198_v48  ;;  %v429_v1 = vsel %vm428_vm0, %v243_v57, %v242_v49  ;;  %v223_v3 = vrot.slane %v222_v60, 4  ;;  %v280_v48 = vld [vmem:[#allocation5 + $0xf0] sm:$0xff]  ;;  %v287_v49 = vld [vmem:[#allocation5 + $0x128] sm:$0xff]  ;;  %v286_v56 = vld [vmem:[#allocation5 + $0x120] sm:$0xff] }
  0x7f   :  { %v212_v2 = vrot.slane %v211_v59, 2  ;;  %v244_v5 = vmul.f32 0.015625, %v176_v58  ;;  %v236_v10 = vrot.slane %v235_v4, 4  ;;  %v1393_v45 = vpack.c.bf16 %v279_v36, %v271_v33  ;;  %v294_v57 = vld [vmem:[#allocation5 + $0x160] sm:$0xff]  ;;  %v344_v33 = vld [vmem:[#allocation5 + $0x2f0] sm:$0xff]  ;;  %v353_v36 = vld [vmem:[#allocation5 + $0x338] sm:$0xff] }
  0x80   :  { %v189_v6 = vadd.f32 %v188_v62, %v187_v55  ;;  %v201_v7 = vrot.slane %v200_v63, 1  ;;  %v224_v9 = vadd.f32 %v223_v3, %v222_v60  ;;  %v1425_v46 = vpack.c.bf16 %v281_v38, %v273_v37  ;;  %v288_v60 = vld [vmem:[#allocation5 + $0x130] sm:$0xff]  ;;  %v303_v62 = vld [vmem:[#allocation5 + $0x1a8] sm:$0xff]  ;;  %v334_v28 = vld [vmem:[#allocation5 + $0x2a0] sm:$0xff] }
  0x81   :  { %v213_v8 = vadd.f32 %v212_v2, %v211_v59  ;;  %v431_v11 = vsel %vm430_vm1, %v244_v5, %v429_v1  ;;  %v237_v16 = vadd.f32 %v236_v10, %v235_v4  ;;  %v1395_v54 = vpack.c.bf16 %v278_v44, %v270_v43  ;;  %v305_v1 = vld [vmem:[#allocation5 + $0x1b8] sm:$0xff]  ;;  %v302_v5 = vld [vmem:[#allocation5 + $0x1a0] sm:$0xff]  ;;  %v312_v10 = vld [vmem:[#allocation5 + $0x1f0] sm:$0xff] }
  0x82   :  { %v202_v12 = vadd.f32 %v201_v7, %v200_v63  ;;  %v245_v13 = vmul.f32 0.015625, %v189_v6  ;;  %v225_v15 = vrot.slane %v224_v9, 2  ;;  %v1427_v55 = vpack.c.bf16 %v280_v48, %v272_v47  ;;  %v311_v63 = vld [vmem:[#allocation5 + $0x1e8] sm:$0xff]  ;;  %v313_v2 = vld [vmem:[#allocation5 + $0x1f8] sm:$0xff]  ;;  %v310_v6 = vld [vmem:[#allocation5 + $0x1e0] sm:$0xff] }
  0x83   :  { %v214_v14 = vrot.slane %v213_v8, 1  ;;  %v238_v21 = vrot.slane %v237_v16, 2  ;;  %v1397_v58 = vpack.c.bf16 %v295_v51, %v287_v49  ;;  %v1429_v59 = vpack.c.bf16 %v297_v53, %v289_v52  ;;  %v342_v29 = vld [vmem:[#allocation5 + $0x2e0] sm:$0xff]  ;;  %v361_v37 = vld [vmem:[#allocation5 + $0x378] sm:$0xff]  ;;  %v352_v44 = vld [vmem:[#allocation5 + $0x330] sm:$0xff] }
  0x84   :  { %v246_v17 = vmul.f32 0.015625, %v202_v12  ;;  %v433_v18 = vsel %vm432_vm2, %v245_v13, %v431_v11  ;;  %v226_v20 = vadd.f32 %v225_v15, %v224_v9  ;;  %v1399_v3 = vpack.c.bf16 %v294_v57, %v286_v56  ;;  %v304_v9 = vld [vmem:[#allocation5 + $0x1b0] sm:$0xff]  ;;  %v319_v11 = vld [vmem:[#allocation5 + $0x228] sm:$0xff]  ;;  %v321_v13 = vld [vmem:[#allocation5 + $0x238] sm:$0xff] }
  0x85   :  { %v215_v19 = vadd.f32 %v214_v14, %v213_v8  ;;  %v239_v23 = vadd.f32 %v238_v21, %v237_v16  ;;  %v1431_v4 = vpack.c.bf16 %v296_v61, %v288_v60  ;;  %v1401_v7 = vpack.c.bf16 %v311_v63, %v303_v62  ;;  %v327_v12 = vld [vmem:[#allocation5 + $0x268] sm:$0xff]  ;;  %v329_v14 = vld [vmem:[#allocation5 + $0x278] sm:$0xff]  ;;  %v318_v16 = vld [vmem:[#allocation5 + $0x220] sm:$0xff] }
  0x86   :  { %v227_v22 = vrot.slane %v226_v20, 1  ;;  %v435_v25 = vsel %vm434_vm3, %v246_v17, %v433_v18  ;;  %v1433_v8 = vpack.c.bf16 %v313_v2, %v305_v1  ;;  %v1403_v15 = vpack.c.bf16 %v310_v6, %v302_v5  ;;  %v326_v17 = vld [vmem:[#allocation5 + $0x260] sm:$0xff]  ;;  %v328_v21 = vld [vmem:[#allocation5 + $0x270] sm:$0xff]  ;;  %v375_v47 = vld [vmem:[#allocation5 + $0x3e8] sm:$0xff] }
  0x87   :  { %v247_v24 = vmul.f32 0.015625, %v215_v19  ;;  %v240_v27 = vrot.slane %v239_v23, 1  ;;  %v1405_v18 = vpack.c.bf16 %v327_v12, %v319_v11  ;;  %v1437_v19 = vpack.c.bf16 %v329_v14, %v321_v13  ;;  %v369_v48 = vld [vmem:[#allocation5 + $0x3b8] sm:$0xff]  ;;  %v366_v53 = vld [vmem:[#allocation5 + $0x3a0] sm:$0xff]  ;;  %v368_v57 = vld [vmem:[#allocation5 + $0x3b0] sm:$0xff] }
  0x88   :  { %v228_v26 = vadd.f32 %v227_v22, %v226_v20  ;;  %v320_v20 = vld [vmem:[#allocation5 + $0x230] sm:$0xff]  ;;  %v335_v22 = vld [vmem:[#allocation5 + $0x2a8] sm:$0xff]  ;;  %v1411_v38 = vpack.c.bf16 %v342_v29, %v334_v28  ;;  %v1445_v43 = vpack.c.bf16 %v361_v37, %v353_v36  ;;  %v377_v49 = vld [vmem:[#allocation5 + $0x3f8] sm:$0xff] }
  0x89   :  { %v437_v30 = vsel %vm436_vm4, %v247_v24, %v435_v25  ;;  %v241_v34 = vadd.f32 %v240_v27, %v239_v23  ;;  %v343_v23 = vld [vmem:[#allocation5 + $0x2e8] sm:$0xff]  ;;  %v337_v24 = vld [vmem:[#allocation5 + $0x2b8] sm:$0xff]  ;;  %v1439_v27 = vpack.c.bf16 %v328_v21, %v320_v20  ;;  %v1449_v56 = vpack.c.bf16 %v377_v49, %v369_v48  ;;  %v768_v60 = vld [vmem:[#allocation8 + $0x88] sm:$0xff] }
  0x8a   :  { %v248_v35 = vmul.f32 0.015625, %v228_v26  ;;  %v345_v25 = vld [vmem:[#allocation5 + $0x2f8] sm:$0xff]  ;;  %v1407_v26 = vpack.c.bf16 %v326_v17, %v318_v16  ;;  %v799_v61 = vld [vmem:[#allocation8 + $0x180] sm:$0xff]  ;;  %v800_v62 = vld [vmem:[#allocation8 + $0x188] sm:$0xff] }
  0x8b   :  { %v249_v39 = vmul.f32 0.015625, %v241_v34  ;;  %v1441_v31 = vpack.c.bf16 %v345_v25, %v337_v24  ;;  %v351_v34 = vld [vmem:[#allocation5 + $0x328] sm:$0xff]  ;;  %v1485_v5 = vpack.c.bf16 %v800_v62, %v799_v61  ;;  %v802_v11 = vld [vmem:[#allocation8 + $0x198] sm:$0xff]  ;;  %v753_v14 = vld [vmem:[#allocation8 + $0x10] sm:$0xff] }
  0x8c   :  { %v439_v40 = vsel %vm438_vm5, %v248_v35, %v437_v30  ;;  %v1409_v30 = vpack.c.bf16 %v343_v23, %v335_v22  ;;  %v359_v35 = vld [vmem:[#allocation5 + $0x368] sm:$0xff]  ;;  %v785_v17 = vld [vmem:[#allocation8 + $0x110] sm:$0xff]  ;;  %v772_v20 = vld [vmem:[#allocation8 + $0xa8] sm:$0xff] }
  0x8d   :  { %v1813_v50 = vsel %vm440_vm6, %v249_v39, %v439_v40  ;;  %v1443_v39 = vpack.c.bf16 %v344_v33, %v336_v32  ;;  %v350_v40 = vld [vmem:[#allocation5 + $0x320] sm:$0xff]  ;;  %v751_v2 = vld [vmem:[#allocation8] sm:$0xff]  ;;  %v804_v22 = vld [vmem:[#allocation8 + $0x1a8] sm:$0xff] }
  0x8e   :  { %508 = vmatmul.mubr.f32.vlgmr.msra.gmra.mrb[0].mxu0 %v1813_v50  ;;  %579 = vmatmul.mubr.f32.vlgmr.msra.gmra.mrb[0].mxu1 %v1813_v50  ;;  %v783_v6 = vld [vmem:[#allocation8 + $0x100] sm:$0xff]  ;;  %v774_v32 = vld [vmem:[#allocation8 + $0xb8] sm:$0xff]  ;;  %v805_v33 = vld [vmem:[#allocation8 + $0x1b0] sm:$0xff] }
  0x8f   :  { %1392 = vmatpush1.bf16.msra.mxu0 %v1391_v41  ;;  %1424 = vmatpush1.bf16.msra.mxu1 %v1423_v42  ;;  %v358_v41 = vld [vmem:[#allocation5 + $0x360] sm:$0xff]  ;;  %v1413_v42 = vpack.c.bf16 %v359_v35, %v351_v34  ;;  %v803_v21 = vld [vmem:[#allocation8 + $0x1a0] sm:$0xff]  ;;  %v757_v36 = vld [vmem:[#allocation8 + $0x30] sm:$0xff] }
  0x90   :  { %1394 = vmatprep.subr.bf16.mxu0 %v1393_v45  ;;  %1426 = vmatprep.subr.bf16.mxu1 %v1425_v46  ;;  %v360_v45 = vld [vmem:[#allocation5 + $0x370] sm:$0xff]  ;;  %v367_v46 = vld [vmem:[#allocation5 + $0x3a8] sm:$0xff]  ;;  %v1415_v51 = vpack.c.bf16 %v358_v41, %v350_v40  ;;  %v1493_v28 = vpack.c.bf16 %v804_v22, %v803_v21  ;;  %v806_v34 = vld [vmem:[#allocation8 + $0x1b8] sm:$0xff] }
  0x91   :  { %649 = vmatprep.mubr.f32.mxu0 %v1717_v0  ;;  %720 = vmatprep.mubr.f32.mxu1 %v1717_v0  ;;  %v1435_v0 = vpack.c.bf16 %v312_v10, %v304_v9  ;;  %v1447_v52 = vpack.c.bf16 %v360_v45, %v352_v44  ;;  %v770_v9 = vld [vmem:[#allocation8 + $0x98] sm:$0xff]  ;;  %v801_v10 = vld [vmem:[#allocation8 + $0x190] sm:$0xff]  ;;  %v755_v25 = vld [vmem:[#allocation8 + $0x20] sm:$0xff] }
  0x92   :  { %v1489_v16 = vpack.c.bf16 %v802_v11, %v801_v10  ;;  %v787_v29 = vld [vmem:[#allocation8 + $0x120] sm:$0xff]  ;;  %v758_v37 = vld [vmem:[#allocation8 + $0x38] sm:$0xff]  ;;  %v789_v40 = vld [vmem:[#allocation8 + $0x130] sm:$0xff] }
  0x93   :  { %1396 = vmatpush1.bf16.msra.mxu0 %v1395_v54  ;;  %1428 = vmatpush1.bf16.msra.mxu1 %v1427_v55  ;;  %v374_v54 = vld [vmem:[#allocation5 + $0x3e0] sm:$0xff]  ;;  %v1417_v55 = vpack.c.bf16 %v375_v47, %v367_v46  ;;  %v807_v44 = vld [vmem:[#allocation8 + $0x1c0] sm:$0xff]  ;;  %v808_v45 = vld [vmem:[#allocation8 + $0x1c8] sm:$0xff]  ;;  %v1467_v46 = vpack.c.bf16 %v758_v37, %v757_v36 }
  0x94   :  { %1398 = vmatprep.subr.bf16.mxu0 %v1397_v58  ;;  %1430 = vmatprep.subr.bf16.mxu1 %v1429_v59  ;;  %v376_v58 = vld [vmem:[#allocation5 + $0x3f0] sm:$0xff]  ;;  %v767_v59 = vld [vmem:[#allocation8 + $0x80] sm:$0xff]  ;;  %v1419_v63 = vpack.c.bf16 %v374_v54, %v366_v53  ;;  %v790_v41 = vld [vmem:[#allocation8 + $0x138] sm:$0xff] }
  0x95   :  { %v1451_v1 = vpack.c.bf16 %v376_v58, %v368_v57  ;;  %v1499_v47 = vpack.c.bf16 %v790_v41, %v789_v40  ;;  %v759_v48 = vld [vmem:[#allocation8 + $0x40] sm:$0xff]  ;;  %v760_v49 = vld [vmem:[#allocation8 + $0x48] sm:$0xff]  ;;  %v809_v57 = vld [vmem:[#allocation8 + $0x1d0] sm:$0xff] }
  0x96   :  { %v791_v53 = vld [vmem:[#allocation8 + $0x140] sm:$0xff]  ;;  %v792_v54 = vld [vmem:[#allocation8 + $0x148] sm:$0xff]  ;;  %v810_v58 = vld [vmem:[#allocation8 + $0x1d8] sm:$0xff] }
  0x97   :  { %1400 = vmatpush1.bf16.msra.mxu0 %v1399_v3  ;;  %1432 = vmatpush1.bf16.msra.mxu1 %v1431_v4  ;;  %v752_v3 = vld [vmem:[#allocation8 + $0x8] sm:$0xff]  ;;  %v1453_v4 = vpack.c.bf16 %v768_v60, %v767_v59  ;;  %v1471_v59 = vpack.c.bf16 %v760_v49, %v759_v48  ;;  %v1503_v60 = vpack.c.bf16 %v792_v54, %v791_v53  ;;  %v761_v61 = vld [vmem:[#allocation8 + $0x50] sm:$0xff]  ;;  %v762_v62 = vld [vmem:[#allocation8 + $0x58] sm:$0xff] }
  0x98   :  { %1402 = vmatprep.subr.bf16.mxu0 %v1401_v7  ;;  %1434 = vmatprep.subr.bf16.mxu1 %v1433_v8  ;;  %v784_v7 = vld [vmem:[#allocation8 + $0x108] sm:$0xff]  ;;  %v769_v8 = vld [vmem:[#allocation8 + $0x90] sm:$0xff]  ;;  %v1455_v12 = vpack.c.bf16 %v752_v3, %v751_v2  ;;  %v794_v3 = vld [vmem:[#allocation8 + $0x158] sm:$0xff] }
  0x99   :  { %v1487_v13 = vpack.c.bf16 %v784_v7, %v783_v6  ;;  %v793_v2 = vld [vmem:[#allocation8 + $0x150] sm:$0xff]  ;;  %v811_v6 = vld [vmem:[#allocation8 + $0x1e0] sm:$0xff]  ;;  %v812_v7 = vld [vmem:[#allocation8 + $0x1e8] sm:$0xff] }
  0x9a   :  { %v1509_v11 = vpack.c.bf16 %v812_v7, %v811_v6  ;;  %v814_v21 = vld [vmem:[#allocation8 + $0x1f8] sm:$0xff]  ;;  %v765_v22 = vld [vmem:[#allocation8 + $0x70] sm:$0xff]  ;;  %v816_v48 = vld [vmem:[#allocation8 + $0x208] sm:$0xff] }
  0x9b   :  { %1404 = vmatpush1.bf16.msra.mxu0 %v1403_v15  ;;  %1436 = vmatpush1.bf16.msra.mxu1 %v1435_v0  ;;  %v754_v15 = vld [vmem:[#allocation8 + $0x18] sm:$0xff]  ;;  %v1457_v0 = vpack.c.bf16 %v770_v9, %v769_v8  ;;  %v1475_v8 = vpack.c.bf16 %v762_v62, %v761_v61  ;;  %v1507_v9 = vpack.c.bf16 %v794_v3, %v793_v2  ;;  %v847_v54 = vld [vmem:[#allocation8 + $0x300] sm:$0xff] }
  0x9c   :  { %1406 = vmatprep.subr.bf16.mxu0 %v1405_v18  ;;  %1438 = vmatprep.subr.bf16.mxu1 %v1437_v19  ;;  %v786_v18 = vld [vmem:[#allocation8 + $0x118] sm:$0xff]  ;;  %v771_v19 = vld [vmem:[#allocation8 + $0xa0] sm:$0xff]  ;;  %v1459_v23 = vpack.c.bf16 %v754_v15, %v753_v14 }
  0x9d   :  { %v1491_v24 = vpack.c.bf16 %v786_v18, %v785_v17  ;;  %v795_v14 = vld [vmem:[#allocation8 + $0x160] sm:$0xff]  ;;  %v781_v17 = vld [vmem:[#allocation8 + $0xf0] sm:$0xff]  ;;  %v782_v18 = vld [vmem:[#allocation8 + $0xf8] sm:$0xff] }
  0x9e   :  { %v866_v61 = vld [vmem:[#allocation8 + $0x398] sm:$0xff] }
  0x9f   :  { %1408 = vmatpush1.bf16.msra.mxu0 %v1407_v26  ;;  %1440 = vmatpush1.bf16.msra.mxu1 %v1439_v27  ;;  %v756_v26 = vld [vmem:[#allocation8 + $0x28] sm:$0xff]  ;;  %v1461_v27 = vpack.c.bf16 %v772_v20, %v771_v19  ;;  %v813_v19 = vld [vmem:[#allocation8 + $0x1f0] sm:$0xff]  ;;  %v1481_v20 = vpack.c.bf16 %v782_v18, %v781_v17  ;;  %v818_v6 = vld [vmem:[#allocation8 + $0x218] sm:$0xff] }
  0xa0   :  { %1410 = vmatprep.subr.bf16.mxu0 %v1409_v30  ;;  %1442 = vmatprep.subr.bf16.mxu1 %v1441_v31  ;;  %v788_v30 = vld [vmem:[#allocation8 + $0x128] sm:$0xff]  ;;  %v773_v31 = vld [vmem:[#allocation8 + $0xb0] sm:$0xff]  ;;  %v1463_v35 = vpack.c.bf16 %v756_v26, %v755_v25 }
  0xa1   :  { %v797_v26 = vld [vmem:[#allocation8 + $0x170] sm:$0xff]  ;;  %v868_v17 = vld [vmem:[#allocation8 + $0x3a8] sm:$0xff] }
  0xa3   :  { %1412 = vmatpush1.bf16.msra.mxu0 %v1411_v38  ;;  %1444 = vmatpush1.bf16.msra.mxu1 %v1443_v39  ;;  %v1465_v38 = vpack.c.bf16 %v774_v32, %v773_v31  ;;  %v1497_v39 = vpack.c.bf16 %v806_v34, %v805_v33  ;;  %v863_v31 = vld [vmem:[#allocation8 + $0x380] sm:$0xff]  ;;  %v864_v33 = vld [vmem:[#allocation8 + $0x388] sm:$0xff] }
  0xa4   :  { %1414 = vmatprep.subr.bf16.mxu0 %v1413_v42  ;;  %1446 = vmatprep.subr.bf16.mxu1 %v1445_v43  ;;  %v775_v42 = vld [vmem:[#allocation8 + $0xc0] sm:$0xff]  ;;  %v776_v43 = vld [vmem:[#allocation8 + $0xc8] sm:$0xff]  ;;  %v1549_v34 = vpack.c.bf16 %v864_v33, %v863_v31  ;;  %v822_v33 = vld [vmem:[#allocation8 + $0x238] sm:$0xff] }
  0xa7   :  { %1416 = vmatpush1.bf16.msra.mxu0 %v1415_v51  ;;  %1448 = vmatpush1.bf16.msra.mxu1 %v1447_v52  ;;  %v1469_v51 = vpack.c.bf16 %v776_v43, %v775_v42  ;;  %v1501_v52 = vpack.c.bf16 %v808_v45, %v807_v44 }
  0xa8   :  { %1418 = vmatprep.subr.bf16.mxu0 %v1417_v55  ;;  %1450 = vmatprep.subr.bf16.mxu1 %v1449_v56  ;;  %v777_v55 = vld [vmem:[#allocation8 + $0xd0] sm:$0xff]  ;;  %v778_v56 = vld [vmem:[#allocation8 + $0xd8] sm:$0xff] }
  0xab   :  { %1420 = vmatpush1.bf16.msra.mxu0 %v1419_v63  ;;  %1452 = vmatpush1.bf16.msra.mxu1 %v1451_v1  ;;  %v1473_v63 = vpack.c.bf16 %v778_v56, %v777_v55  ;;  %v1505_v1 = vpack.c.bf16 %v810_v58, %v809_v57  ;;  %v848_v55 = vld [vmem:[#allocation8 + $0x308] sm:$0xff]  ;;  %v833_v56 = vld [vmem:[#allocation8 + $0x290] sm:$0xff] }
  0xac   :  { %1454 = vmatprep.subr.bf16.mxu0 %v1453_v4  ;;  %1486 = vmatprep.subr.bf16.mxu1 %v1485_v5  ;;  %v779_v4 = vld [vmem:[#allocation8 + $0xe0] sm:$0xff]  ;;  %v780_v5 = vld [vmem:[#allocation8 + $0xe8] sm:$0xff] }
  0xad   :  { %v1477_v10 = vpack.c.bf16 %v780_v5, %v779_v4  ;;  %v1551_v4 = vpack.c.bf16 %v848_v55, %v847_v54  ;;  %v817_v5 = vld [vmem:[#allocation8 + $0x210] sm:$0xff]  ;;  %v874_v55 = vld [vmem:[#allocation8 + $0x3d8] sm:$0xff] }
  0xae   :  { %650 = vmatmul.mubr.f32.vlgmr.msra.gmra.mrb[2].mxu0 %v1813_v50  ;;  %721 = vmatmul.mubr.f32.vlgmr.msra.gmra.mrb[2].mxu1 %v1813_v50  ;;  %v1495_v50 = vpack.c.bf16 %v788_v30, %v787_v29  ;;  %v831_v29 = vld [vmem:[#allocation8 + $0x280] sm:$0xff]  ;;  %v832_v30 = vld [vmem:[#allocation8 + $0x288] sm:$0xff]  ;;  %v1523_v18 = vpack.c.bf16 %v818_v6, %v817_v5  ;;  %v873_v54 = vld [vmem:[#allocation8 + $0x3d0] sm:$0xff] }
  0xaf   :  { %1456 = vmatpush3.bf16.msra.mxu0 %v1455_v12  ;;  %1488 = vmatpush3.bf16.msra.mxu1 %v1487_v13  ;;  %v763_v12 = vld [vmem:[#allocation8 + $0x60] sm:$0xff]  ;;  %v764_v13 = vld [vmem:[#allocation8 + $0x68] sm:$0xff]  ;;  %v1517_v32 = vpack.c.bf16 %v832_v30, %v831_v29  ;;  %v870_v29 = vld [vmem:[#allocation8 + $0x3b8] sm:$0xff] }
  0xb0   :  { %1458 = vmatprep.subr.bf16.mxu0 %v1457_v0  ;;  %1490 = vmatprep.subr.bf16.mxu1 %v1489_v16  ;;  %v1479_v15 = vpack.c.bf16 %v764_v13, %v763_v12  ;;  %v796_v0 = vld [vmem:[#allocation8 + $0x168] sm:$0xff]  ;;  %v850_v12 = vld [vmem:[#allocation8 + $0x318] sm:$0xff]  ;;  %v835_v13 = vld [vmem:[#allocation8 + $0x2a0] sm:$0xff] }
  0xb1   :  { %v1511_v16 = vpack.c.bf16 %v796_v0, %v795_v14  ;;  %v836_v0 = vld [vmem:[#allocation8 + $0x2a8] sm:$0xff] }
  0xb3   :  { %1460 = vmatpush3.bf16.msra.mxu0 %v1459_v23  ;;  %1492 = vmatpush3.bf16.msra.mxu1 %v1491_v24  ;;  %v766_v23 = vld [vmem:[#allocation8 + $0x78] sm:$0xff]  ;;  %v1513_v24 = vpack.c.bf16 %v814_v21, %v813_v19  ;;  %v820_v21 = vld [vmem:[#allocation8 + $0x228] sm:$0xff] }
  0xb4   :  { %1462 = vmatprep.subr.bf16.mxu0 %v1461_v27  ;;  %1494 = vmatprep.subr.bf16.mxu1 %v1493_v28  ;;  %v1483_v25 = vpack.c.bf16 %v766_v23, %v765_v22  ;;  %v798_v27 = vld [vmem:[#allocation8 + $0x178] sm:$0xff]  ;;  %v1525_v22 = vpack.c.bf16 %v836_v0, %v835_v13  ;;  %v860_v0 = vld [vmem:[#allocation8 + $0x368] sm:$0xff] }
  0xb5   :  { %v1515_v28 = vpack.c.bf16 %v798_v27, %v797_v26  ;;  %v837_v26 = vld [vmem:[#allocation8 + $0x2b0] sm:$0xff]  ;;  %v838_v27 = vld [vmem:[#allocation8 + $0x2b8] sm:$0xff] }
  0xb7   :  { %1464 = vmatpush3.bf16.msra.mxu0 %v1463_v35  ;;  %1496 = vmatpush3.bf16.msra.mxu1 %v1495_v50  ;;  %v380_v35 = vlaneseq }
  0xb8   :  { %1466 = vmatprep.subr.bf16.mxu0 %v1465_v38  ;;  %1498 = vmatprep.subr.bf16.mxu1 %v1497_v39  ;;  %v1825_v38 = vld [vmem:[#allocation7] sm:$0xff] }
  0xb9   :  { %v1821_v50 = vshrl.u32 %v380_v35, 7 }
  0xbb   :  { %1468 = vmatpush3.bf16.msra.mxu0 %v1467_v46  ;;  %1500 = vmatpush3.bf16.msra.mxu1 %v1499_v47  ;;  %v382_v36 = vsub.s32 0, %v1821_v50  ;;  %v390_v37 = vsub.s32 2, %v1821_v50  ;;  %v386_v39 = vsub.s32 1, %v1821_v50  ;;  %v394_v40 = vsub.s32 3, %v1821_v50  ;;  %v815_v47 = vld [vmem:[#allocation8 + $0x200] sm:$0xff] }
  0xbc   :  { %1470 = vmatprep.subr.bf16.mxu0 %v1469_v51  ;;  %1502 = vmatprep.subr.bf16.mxu1 %v1501_v52  ;;  %v1519_v3 = vpack.c.bf16 %v816_v48, %v815_v47  ;;  %v398_v5 = vsub.s32 4, %v1821_v50  ;;  %v406_v6 = vsub.s32 6, %v1821_v50 }
  0xbd   :  { %v383_v41 = vrot.slane %v1825_v38, %v382_v36  ;;  %v391_v42 = vrot.slane %v1825_v38, %v390_v37  ;;  %v387_v43 = vrot.slane %v1825_v38, %v386_v39  ;;  %v395_v44 = vrot.slane %v1825_v38, %v394_v40  ;;  %v853_v36 = vld [vmem:[#allocation8 + $0x330] sm:$0xff]  ;;  %v854_v37 = vld [vmem:[#allocation8 + $0x338] sm:$0xff]  ;;  %v839_v39 = vld [vmem:[#allocation8 + $0x2c0] sm:$0xff] }
  0xbe   :  { %v840_v40 = vld [vmem:[#allocation8 + $0x2c8] sm:$0xff] }
  0xbf   :  { %1472 = vmatpush3.bf16.msra.mxu0 %v1471_v59  ;;  %1504 = vmatpush3.bf16.msra.mxu1 %v1503_v60  ;;  %v834_v59 = vld [vmem:[#allocation8 + $0x298] sm:$0xff]  ;;  %v865_v60 = vld [vmem:[#allocation8 + $0x390] sm:$0xff]  ;;  %v1533_v47 = vpack.c.bf16 %v840_v40, %v839_v39 }
  0xc0   :  { %1474 = vmatprep.subr.bf16.mxu0 %v1473_v63  ;;  %1506 = vmatprep.subr.bf16.mxu1 %v1505_v1 }
  0xc3   :  { %1476 = vmatpush3.bf16.msra.mxu0 %v1475_v8  ;;  %1508 = vmatpush3.bf16.msra.mxu1 %v1507_v9  ;;  %v1521_v9 = vpack.c.bf16 %v834_v59, %v833_v56  ;;  %v826_v59 = vld [vmem:[#allocation8 + $0x258] sm:$0xff] }
  0xc4   :  { %1478 = vmatprep.subr.bf16.mxu0 %v1477_v10  ;;  %1510 = vmatprep.subr.bf16.mxu1 %v1509_v11  ;;  %v1553_v10 = vpack.c.bf16 %v866_v61, %v865_v60  ;;  %v849_v11 = vld [vmem:[#allocation8 + $0x310] sm:$0xff]  ;;  %v1569_v61 = vpack.c.bf16 %v874_v55, %v873_v54 }
  0xc5   :  { %v1555_v19 = vpack.c.bf16 %v850_v12, %v849_v11  ;;  %v828_v11 = vld [vmem:[#allocation8 + $0x268] sm:$0xff] }
  0xc7   :  { %1480 = vmatpush3.bf16.msra.mxu0 %v1479_v15  ;;  %1512 = vmatpush3.bf16.msra.mxu1 %v1511_v16  ;;  %v867_v16 = vld [vmem:[#allocation8 + $0x3a0] sm:$0xff] }
  0xc8   :  { %1482 = vmatprep.subr.bf16.mxu0 %v1481_v20  ;;  %1514 = vmatprep.subr.bf16.mxu1 %v1513_v24  ;;  %v819_v20 = vld [vmem:[#allocation8 + $0x220] sm:$0xff]  ;;  %v1557_v23 = vpack.c.bf16 %v868_v17, %v867_v16  ;;  %v845_v16 = vld [vmem:[#allocation8 + $0x2f0] sm:$0xff]  ;;  %v846_v17 = vld [vmem:[#allocation8 + $0x2f8] sm:$0xff] }
  0xc9   :  { %v851_v24 = vld [vmem:[#allocation8 + $0x320] sm:$0xff]  ;;  %v1527_v30 = vpack.c.bf16 %v820_v21, %v819_v20  ;;  %v399_v20 = vrot.slane %v1825_v38, %v398_v5  ;;  %v407_v21 = vrot.slane %v1825_v38, %v406_v6 }
  0xcb   :  { %1484 = vmatpush3.bf16.msra.mxu0 %v1483_v25  ;;  %1516 = vmatpush3.bf16.msra.mxu1 %v1515_v28  ;;  %v852_v25 = vld [vmem:[#allocation8 + $0x328] sm:$0xff]  ;;  %v869_v28 = vld [vmem:[#allocation8 + $0x3b0] sm:$0xff] }
  0xcc   :  { %1518 = vmatprep.subr.bf16.mxu0 %v1517_v32  ;;  %1550 = vmatprep.subr.bf16.mxu1 %v1549_v34  ;;  %v1559_v31 = vpack.c.bf16 %v852_v25, %v851_v24  ;;  %v821_v32 = vld [vmem:[#allocation8 + $0x230] sm:$0xff]  ;;  %v1529_v34 = vpack.c.bf16 %v838_v27, %v837_v26  ;;  %v1561_v35 = vpack.c.bf16 %v870_v29, %v869_v28  ;;  %v830_v26 = vld [vmem:[#allocation8 + $0x278] sm:$0xff] }
  0xcd   :  { %v829_v25 = vld [vmem:[#allocation8 + $0x270] sm:$0xff]  ;;  %v1545_v27 = vpack.c.bf16 %v846_v17, %v845_v16 }
  0xce   :  { %v861_v29 = vld [vmem:[#allocation8 + $0x370] sm:$0xff] }
 0x161   :  { %v509_v45 = vpop.f32.mrb[0].mxu0  ;;  %v580_v46 = vpop.f32.mrb[0].mxu1 }
 0x162   :  { %v510_v49 = vadd.f32 %v509_v45, %v383_v41  ;;  %v581_v51 = vadd.f32 %v580_v46, %v391_v42  ;;  %v511_v52 = vpop.f32.mrb[1].mxu0  ;;  %v582_v53 = vpop.f32.mrb[1].mxu1  ;;  %v871_v41 = vld [vmem:[#allocation8 + $0x3c0] sm:$0xff]  ;;  %v872_v42 = vld [vmem:[#allocation8 + $0x3c8] sm:$0xff] }
 0x163   :  { %v512_v57 = vadd.f32 %v511_v52, %v387_v43  ;;  %v583_v58 = vadd.f32 %v582_v53, %v395_v44  ;;  %v1531_v43 = vpack.c.bf16 %v822_v33, %v821_v32  ;;  %v1563_v44 = vpack.c.bf16 %v854_v37, %v853_v36  ;;  %v823_v45 = vld [vmem:[#allocation8 + $0x240] sm:$0xff]  ;;  %v824_v46 = vld [vmem:[#allocation8 + $0x248] sm:$0xff]  ;;  %v841_v52 = vld [vmem:[#allocation8 + $0x2d0] sm:$0xff] }
 0x164   :  { %vm727_vm7 = vcmp.gt.f32.partialorder %v510_v49, 0.0  ;;  %v735_v62 = vmul.f32 0.01, %v510_v49  ;;  %vm729_vm8 = vcmp.gt.f32.partialorder %v581_v51, 0.0  ;;  %v737_v63 = vmul.f32 0.01, %v581_v51 }
 0x165   :  { %v736_v1 = vmul.f32 0.01, %v512_v57  ;;  %v738_v2 = vmul.f32 0.01, %v583_v58  ;;  %vm728_vm9 = vcmp.gt.f32.partialorder %v512_v57, 0.0  ;;  %vm730_vm10 = vcmp.gt.f32.partialorder %v583_v58, 0.0 }
 0x166   :  { %v743_v14 = vsel %vm727_vm7, %v510_v49, %v735_v62  ;;  %v745_v15 = vsel %vm729_vm8, %v581_v51, %v737_v63  ;;  %v1565_v48 = vpack.c.bf16 %v872_v42, %v871_v41  ;;  %v855_v49 = vld [vmem:[#allocation8 + $0x340] sm:$0xff]  ;;  %v856_v51 = vld [vmem:[#allocation8 + $0x348] sm:$0xff]  ;;  %v842_v53 = vld [vmem:[#allocation8 + $0x2d8] sm:$0xff]  ;;  %v1535_v56 = vpack.c.bf16 %v824_v46, %v823_v45 }
 0x167   :  { %v744_v7 = vsel %vm728_vm9, %v512_v57, %v736_v1  ;;  %v746_v8 = vsel %vm730_vm10, %v583_v58, %v738_v2  ;;  %v1567_v57 = vpack.c.bf16 %v856_v51, %v855_v49  ;;  %v825_v58 = vld [vmem:[#allocation8 + $0x250] sm:$0xff]  ;;  %v1537_v60 = vpack.c.bf16 %v842_v53, %v841_v52  ;;  %v858_v63 = vld [vmem:[#allocation8 + $0x358] sm:$0xff]  ;;  %v843_v1 = vld [vmem:[#allocation8 + $0x2e0] sm:$0xff] }
 0x168   :  { %950 = vmatprep.mubr.f32.mxu0 %v744_v7  ;;  %1020 = vmatprep.mubr.f32.mxu1 %v746_v8  ;;  %v857_v62 = vld [vmem:[#allocation8 + $0x350] sm:$0xff]  ;;  %v844_v2 = vld [vmem:[#allocation8 + $0x2e8] sm:$0xff]  ;;  %v1539_v7 = vpack.c.bf16 %v826_v59, %v825_v58  ;;  %v1547_v33 = vpack.c.bf16 %v830_v26, %v829_v25  ;;  %v1184_v52 = vld [vmem:[%s1862_s4] ss:$0 sm:$0xff] }
 0x169   :  { %951 = vmatmul.mubr.f32.vlgmr.msra.gmra.mrb[4].mxu0 %v743_v14  ;;  %1021 = vmatmul.mubr.f32.vlgmr.msra.gmra.mrb[4].mxu1 %v745_v15  ;;  %v1571_v8 = vpack.c.bf16 %v858_v63, %v857_v62  ;;  %v1541_v12 = vpack.c.bf16 %v844_v2, %v843_v1  ;;  %v410_v14 = vsub.s32 7, %v1821_v50  ;;  %v859_v15 = vld [vmem:[#allocation8 + $0x360] sm:$0xff] }
 0x16a   :  { %1520 = vmatpush3.bf16.msra.mxu0 %v1519_v3  ;;  %1552 = vmatpush3.bf16.msra.mxu1 %v1551_v4  ;;  %v875_v3 = vld [vmem:[#allocation8 + $0x3e0] sm:$0xff]  ;;  %v876_v4 = vld [vmem:[#allocation8 + $0x3e8] sm:$0xff]  ;;  %v1575_v24 = vpack.c.bf16 %v860_v0, %v859_v15 }
 0x16b   :  { %1522 = vmatprep.subr.bf16.mxu0 %v1521_v9  ;;  %1554 = vmatprep.subr.bf16.mxu1 %v1553_v10  ;;  %v402_v9 = vsub.s32 5, %v1821_v50  ;;  %v827_v10 = vld [vmem:[#allocation8 + $0x260] sm:$0xff]  ;;  %v1573_v13 = vpack.c.bf16 %v876_v4, %v875_v3  ;;  %v411_v50 = vrot.slane %v1825_v38, %v410_v14 }
 0x16e   :  { %1524 = vmatpush3.bf16.msra.mxu0 %v1523_v18  ;;  %1556 = vmatpush3.bf16.msra.mxu1 %v1555_v19  ;;  %v877_v18 = vld [vmem:[#allocation8 + $0x3f0] sm:$0xff]  ;;  %v878_v19 = vld [vmem:[#allocation8 + $0x3f8] sm:$0xff] }
 0x16f   :  { %1526 = vmatprep.subr.bf16.mxu0 %v1525_v22  ;;  %1558 = vmatprep.subr.bf16.mxu1 %v1557_v23  ;;  %v403_v22 = vrot.slane %v1825_v38, %v402_v9  ;;  %v1543_v23 = vpack.c.bf16 %v828_v11, %v827_v10  ;;  %v1577_v28 = vpack.c.bf16 %v878_v19, %v877_v18 }
 0x172   :  { %1528 = vmatpush3.bf16.msra.mxu0 %v1527_v30  ;;  %1560 = vmatpush3.bf16.msra.mxu1 %v1559_v31  ;;  %v862_v30 = vld [vmem:[#allocation8 + $0x378] sm:$0xff] }
 0x173   :  { %1530 = vmatprep.subr.bf16.mxu0 %v1529_v34  ;;  %1562 = vmatprep.subr.bf16.mxu1 %v1561_v35  ;;  %v1579_v39 = vpack.c.bf16 %v862_v30, %v861_v29 }
 0x176   :  { %1532 = vmatpush3.bf16.msra.mxu0 %v1531_v43  ;;  %1564 = vmatpush3.bf16.msra.mxu1 %v1563_v44 }
 0x177   :  { %1534 = vmatprep.subr.bf16.mxu0 %v1533_v47  ;;  %1566 = vmatprep.subr.bf16.mxu1 %v1565_v48 }
 0x17a   :  { %1536 = vmatpush3.bf16.msra.mxu0 %v1535_v56  ;;  %1568 = vmatpush3.bf16.msra.mxu1 %v1567_v57 }
 0x17b   :  { %1538 = vmatprep.subr.bf16.mxu0 %v1537_v60  ;;  %1570 = vmatprep.subr.bf16.mxu1 %v1569_v61 }
 0x17e   :  { %1540 = vmatpush3.bf16.msra.mxu0 %v1539_v7  ;;  %1572 = vmatpush3.bf16.msra.mxu1 %v1571_v8 }
 0x17f   :  { %1542 = vmatprep.subr.bf16.mxu0 %v1541_v12  ;;  %1574 = vmatprep.subr.bf16.mxu1 %v1573_v13 }
 0x181   :  { %v651_v31 = vpop.f32.mrb[2].mxu0  ;;  %v722_v32 = vpop.f32.mrb[2].mxu1 }
 0x182   :  { %v652_v34 = vadd.f32 %v651_v31, %v399_v20  ;;  %v723_v35 = vadd.f32 %v722_v32, %v407_v21  ;;  %v653_v36 = vpop.f32.mrb[3].mxu0  ;;  %v724_v37 = vpop.f32.mrb[3].mxu1  ;;  %1544 = vmatpush3.bf16.msra.mxu0 %v1543_v23  ;;  %1576 = vmatpush3.bf16.msra.mxu1 %v1575_v24 }
 0x183   :  { %v654_v40 = vadd.f32 %v653_v36, %v403_v22  ;;  %v725_v41 = vadd.f32 %v724_v37, %v411_v50  ;;  %1546 = vmatprep.subr.bf16.mxu0 %v1545_v27  ;;  %1578 = vmatprep.subr.bf16.mxu1 %v1577_v28 }
 0x184   :  { %vm731_vm11 = vcmp.gt.f32.partialorder %v652_v34, 0.0  ;;  %v739_v38 = vmul.f32 0.01, %v652_v34  ;;  %vm733_vm12 = vcmp.gt.f32.partialorder %v723_v35, 0.0  ;;  %v741_v42 = vmul.f32 0.01, %v723_v35 }
 0x185   :  { %v740_v43 = vmul.f32 0.01, %v654_v40  ;;  %v742_v44 = vmul.f32 0.01, %v725_v41  ;;  %vm732_vm13 = vcmp.gt.f32.partialorder %v654_v40, 0.0  ;;  %vm734_vm14 = vcmp.gt.f32.partialorder %v725_v41, 0.0 }
 0x186   :  { %1548 = vmatpush3.bf16.msra.mxu0 %v1547_v33  ;;  %1580 = vmatpush3.bf16.msra.mxu1 %v1579_v39  ;;  %v747_v47 = vsel %vm731_vm11, %v652_v34, %v739_v38  ;;  %v749_v48 = vsel %vm733_vm12, %v723_v35, %v741_v42 }
 0x187   :  { %v748_v45 = vsel %vm732_vm13, %v654_v40, %v740_v43  ;;  %v750_v46 = vsel %vm734_vm14, %v725_v41, %v742_v44 }
 0x188   :  { %1090 = vmatprep.mubr.f32.mxu0 %v748_v45  ;;  %1160 = vmatprep.mubr.f32.mxu1 %v750_v46 }
 0x189   :  { %1091 = vmatmul.mubr.f32.vlgmr.msra.gmra.mrb[6].mxu0 %v747_v47  ;;  %1161 = vmatmul.mubr.f32.vlgmr.msra.gmra.mrb[6].mxu1 %v749_v48 }
 0x23c   :  { %v1217_v49 = vpop.f32.mrb[4].mxu0  ;;  %v1252_v51 = vpop.f32.mrb[4].mxu1 }
 0x23d   :  { %v1218_v53 = vpop.f32.mrb[5].mxu0  ;;  %v1253_v54 = vpop.f32.mrb[5].mxu1 }
 0x23e   :  { %v1219_v55 = vadd.f32 %v1218_v53, %v1217_v49  ;;  %v1254_v56 = vadd.f32 %v1253_v54, %v1252_v51 }
 0x240   :  { %v953_v57 = vadd.f32 %v1219_v55, %v1184_v52 }
 0x242   :  { %v1023_v58 = vadd.f32 %v1254_v56, %v953_v57 }
 0x25c   :  { %v1287_v59 = vpop.f32.mrb[6].mxu0  ;;  %v1322_v60 = vpop.f32.mrb[6].mxu1 }
 0x25d   :  { %v1288_v61 = vpop.f32.mrb[7].mxu0  ;;  %v1323_v62 = vpop.f32.mrb[7].mxu1 }
 0x25e   :  { %v1289_v63 = vadd.f32 %v1288_v61, %v1287_v59  ;;  %v1324_v1 = vadd.f32 %v1323_v62, %v1322_v60 }
 0x260   :  { %v1093_v2 = vadd.f32 %v1289_v63, %v1023_v58 }
 0x262   :  { %v1163_v3 = vadd.f32 %v1324_v1, %v1093_v2 }
 0x264   :  { %1166 = vst [vmem:[#allocation10] sm:$0xff] %v1163_v3 }
 0x265   :  { %1690 = shalt.err (!%p1687_p8)
}
 0x266   :  { %s1691_s21 = scalar_lea.hbm %s1863_s5, 128 }
 0x267   :  { %p1692_p9 = scmp.ne.s32.totalorder %s1863_s5, %s1691_s21  ;;  %p1695_p10 = scmp.lt.u32.totalorder %s1691_s21, %s1863_s5 }
 0x269   :  { %p1697_p11 = pnand %p1695_p10, %p1692_p9 }
 0x26b   :  { %1700 = shalt.err (!%p1697_p11)
}
 0x26c   :  { %1176 = dma.vmem_to_hbm [thread:$0]  %s1174_s18, 128, %s1863_s5, [#allocation4]  }
 0x26d   :  { %1707 = dma.done.wait [#allocation4], 128  }
 0x26e   :  { %1708 = vsyncadd [#allocation4], 4294967168 }
 0x26f   :  { %1180 = vsyncpa [#allocation3], 1 }
 0x270   :  { %1181 = vsyncpa [#allocation6], 1 }
 0x271   :  { %1182 = vsyncpa [#allocation9], 1 }
 0x272   :  { %1183 = vsyncpa [#allocation4], 1 }

</bundles_post_ra>
